<compile_context>
chip_gen: v6e
topology: v6e:2x2x1
jax: 0.10.0
libtpu: 0.0.40
codegen_flags: <defaults>
</compile_context>

<pallas_src>
import functools

import jax
import jax.numpy as jnp
from jax import lax
from jax.experimental import pallas as pl
from jax.experimental.pallas import tpu as pltpu


def _round_up(x, m):
    return ((x + m - 1) // m) * m


# --------------------------------------------------------------------------
# Kernel 1: token classification head  (hidden @ W + b), tiled over rows.
# --------------------------------------------------------------------------
def _head_kernel(h_ref, w_ref, b_ref, o_ref):
    o_ref[...] = (jnp.dot(h_ref[...], w_ref[...],
                          preferred_element_type=jnp.float32)
                  + b_ref[...]).astype(o_ref.dtype)


def token_classifier_head(hidden2d, w, b, *, tm=512):
    """hidden2d: [M, H]; w: [H, T]; b: [1, T] -> logits [M, T] (float32)."""
    M, H = hidden2d.shape
    T = w.shape[1]
    T_pad = _round_up(T, 128)            # lane-dense output -> unmasked stores
    TM = min(tm, _round_up(M, 8))        # row tile, multiple of 8 sublanes
    M_pad = _round_up(M, TM)

    h_p = jnp.pad(hidden2d.astype(jnp.float32), ((0, M_pad - M), (0, 0)))
    w_p = jnp.pad(w.astype(jnp.float32), ((0, 0), (0, T_pad - T)))
    b_p = jnp.pad(b.astype(jnp.float32), ((0, 0), (0, T_pad - T)))

    out = pl.pallas_call(
        _head_kernel,
        out_shape=jax.ShapeDtypeStruct((M_pad, T_pad), jnp.float32),
        grid=(M_pad // TM,),
        in_specs=[pl.BlockSpec((TM, H), lambda i: (i, 0)),
                  pl.BlockSpec((H, T_pad), lambda i: (0, 0)),
                  pl.BlockSpec((1, T_pad), lambda i: (0, 0))],
        out_specs=pl.BlockSpec((TM, T_pad), lambda i: (i, 0)),
        compiler_params=pltpu.CompilerParams(
            dimension_semantics=("parallel",),
            vmem_limit_bytes=32 * 1024 * 1024),
    )(h_p, w_p, b_p)
    return out[:M, :T]


# --------------------------------------------------------------------------
# Kernel 2: CRF negative log-likelihood (reduction='mean', batch_first=True)
#           Batch sits on the lane axis: emissions [L, T, B], alpha [T, B].
# --------------------------------------------------------------------------
def _crf_nll_kernel(em_ref, tags_ref, mask_ref, start_ref, end_ref,
                    trans_pair_ref, trans_sq_ref, llh_ref,
                    *, num_tags, seq_len, batch):
    T, L, B = num_tags, seq_len, batch
    del batch  # shapes are static; B only used for documentation

    em = em_ref[...]                    # [L, T, B] f32
    tags = tags_ref[...]                # [L, B]    int32
    mask = mask_ref[...]                # [L, B]    f32 (1.0 valid / 0.0 pad)
    start_c = start_ref[...]            # [T, 1]
    end_c = end_ref[...]                # [T, 1]
    trans_pair = trans_pair_ref[...]    # [T*T, 1]; trans_pair[i*T+j] = trans[i,j]
    trans_sq = trans_sq_ref[...]        # [T, T, 1]

    # ---- numerator: score of the gold tag path ---------------------------
    # NOTE: assumes every row has at least one valid token (mask[0, :] == 1),
    # same precondition torchcrf enforces.
    iota_t = lax.broadcasted_iota(jnp.int32, (T, 1), 0)             # [T, 1]
    onehot = tags[:, None, :] == iota_t[None, :, :]                 # [L, T, B]

    emit_g = jnp.sum(jnp.where(onehot, em, 0.0), axis=1)            # [L, B]
    start_g = jnp.sum(jnp.where(onehot[0], start_c, 0.0),
                      axis=0, keepdims=True)                        # [1, B]
    end_of_tags = jnp.sum(jnp.where(onehot, end_c[None, :, :], 0.0),
                          axis=1)                                   # [L, B]

    # trans[tags[l-1], tags[l]] via one flat-index one-hot contraction
    idx = tags[:L - 1, :] * T + tags[1:, :]                         # [L-1, B]
    iota_tt = lax.broadcasted_iota(jnp.int32, (T * T, 1), 0)        # [T*T, 1]
    pair_onehot = idx[:, None, :] == iota_tt[None, :, :]            # [L-1,T*T,B]
    trans_g = jnp.sum(jnp.where(pair_onehot, trans_pair[None, :, :], 0.0),
                      axis=1)                                       # [L-1, B]

    numerator = start_g + emit_g[0:1, :]                            # [1, B]
    numerator = numerator + jnp.sum((trans_g + emit_g[1:, :]) * mask[1:, :],
                                    axis=0, keepdims=True)

    seq_lens = jnp.sum(mask, axis=0, keepdims=True).astype(jnp.int32)  # [1, B]
    pos = lax.broadcasted_iota(jnp.int32, (L, B), 0)
    last_onehot = pos == (seq_lens - 1)                             # [L, B]
    numerator = numerator + jnp.sum(jnp.where(last_onehot, end_of_tags, 0.0),
                                    axis=0, keepdims=True)

    # ---- denominator: log-partition via the forward algorithm ------------
    alpha0 = start_c + em_ref[0]                                    # [T, B]

    def step(t, alpha):
        em_t = em_ref[t]                                            # [T, B]
        # scores[i, j, b] = alpha[i, b] + trans[i, j]
        scores = alpha[:, None, :] + trans_sq                       # [T, T, B]
        m = jnp.max(scores, axis=0)                                 # [T, B]
        s = jnp.sum(jnp.exp(scores - m[None, :, :]), axis=0)        # [T, B]
        nxt = jnp.log(s) + m + em_t                                 # [T, B]
        mt = mask_ref[pl.ds(t, 1), :] > 0.0                         # [1, B]
        return jnp.where(mt, nxt, alpha)

    alpha = lax.fori_loop(1, L, step, alpha0)

    final = alpha + end_c                                           # [T, B]
    m2 = jnp.max(final, axis=0, keepdims=True)                      # [1, B]
    denom = jnp.log(jnp.sum(jnp.exp(final - m2), axis=0, keepdims=True)) + m2

    llh_ref[...] = numerator - denom                                # [1, B]


def crf_nll(em_ltb, tags_lb, mask_lb, start, end, trans):
    """em_ltb: [L, T, B]; tags/mask: [L, B]; start/end: [T]; trans: [T, T]."""
    L, T, B = em_ltb.shape
    start_c = start.reshape(T, 1).astype(jnp.float32)
    end_c = end.reshape(T, 1).astype(jnp.float32)
    trans_pair = trans.reshape(T * T, 1).astype(jnp.float32)
    trans_sq = trans.reshape(T, T, 1).astype(jnp.float32)
    kernel = functools.partial(_crf_nll_kernel, num_tags=T, seq_len=L, batch=B)
    llh = pl.pallas_call(
        kernel,
        out_shape=jax.ShapeDtypeStruct((1, B), jnp.float32),
        grid=(1,),
        in_specs=[pl.BlockSpec((L, T, B), lambda i: (0, 0, 0)),
                  pl.BlockSpec((L, B), lambda i: (0, 0)),
                  pl.BlockSpec((L, B), lambda i: (0, 0)),
                  pl.BlockSpec((T, 1), lambda i: (0, 0)),
                  pl.BlockSpec((T, 1), lambda i: (0, 0)),
                  pl.BlockSpec((T * T, 1), lambda i: (0, 0)),
                  pl.BlockSpec((T, T, 1), lambda i: (0, 0, 0))],
        out_specs=pl.BlockSpec((1, B), lambda i: (0, 0)),
    )(em_ltb.astype(jnp.float32), tags_lb.astype(jnp.int32),
      mask_lb.astype(jnp.float32), start_c, end_c, trans_pair, trans_sq)
    # torchcrf reduction='mean' == per-sequence mean of the log-likelihood.
    return -jnp.mean(llh)


# --------------------------------------------------------------------------
# Plain-JAX glue (parameter setup, per-sequence compaction / padding)
# --------------------------------------------------------------------------
def make_bio_crf_params(key, num_tags):
    """torchcrf init U(-0.1, 0.1) + BIO_Tag_CRF constraints."""
    assert num_tags % 2 == 1
    k1, k2, k3 = jax.random.split(key, 3)
    start = jax.random.uniform(k1, (num_tags,), jnp.float32, -0.1, 0.1)
    end = jax.random.uniform(k2, (num_tags,), jnp.float32, -0.1, 0.1)
    trans = jax.random.uniform(k3, (num_tags, num_tags), jnp.float32, -0.1, 0.1)
    num_uniq = (num_tags - 1) // 2
    for i in range(num_uniq, 2 * num_uniq):
        start = start.at[i].set(-10000.0)
        for j in range(num_tags):
            if j == i or j + num_uniq == i:
                continue
            trans = trans.at[j, i].set(-10000.0)
    return start, end, trans


def compact_and_pad(logits, labels, mask):
    """Mimics `logit[mask]` + pad_sequence(padding_value=0) from BIO_Tag_CRF.

    Each row is stably permuted so that valid (mask=True) positions come
    first; padded positions get logits=0, label=0, mask=0.  Trailing
    all-masked columns do not change the CRF loss, so full length S is kept."""
    sort_key = jnp.where(mask, 0, 1).astype(jnp.int32)
    perm = jnp.argsort(sort_key, axis=1, stable=True)
    sorted_mask = jnp.take_along_axis(mask, perm, axis=1)
    g_logits = jnp.take_along_axis(logits, perm[:, :, None], axis=1)
    g_labels = jnp.take_along_axis(labels, perm, axis=1)
    padded_logits = jnp.where(sorted_mask[:, :, None], g_logits, 0.0)
    padded_labels = jnp.where(sorted_mask, g_labels, 0).astype(jnp.int32)
    padded_mask = sorted_mask.astype(jnp.float32)
    return padded_logits, padded_labels, padded_mask


def bert_crf_forward(hidden, labels, params):
    """Training-mode forward of BERT_CRF -> (loss,)."""
    B, S, H = hidden.shape
    T = params["w"].shape[1]
    logits = token_classifier_head(
        hidden.reshape(B * S, H), params["w"], params["b"]).reshape(B, S, T)
    mask = labels != -100
    p_logits, p_labels, p_mask = compact_and_pad(logits, labels, mask)
    # transpose to the batch-on-lanes layout expected by the CRF kernel
    em_ltb = jnp.transpose(p_logits, (1, 2, 0))      # [S, T, B]
    tags_lb = jnp.transpose(p_labels, (1, 0))        # [S, B]
    mask_lb = jnp.transpose(p_mask, (1, 0))          # [S, B]
    loss = crf_nll(em_ltb, tags_lb, mask_lb,
                   params["start"], params["end"], params["trans"])
    return (loss,)


# --------------------------------------------------------------------------
if __name__ == "__main__":
    B, S, H, T = 2, 16, 32, 5          # num_labels = 5 (2 B-, 2 I-, 1 O)
    key = jax.random.PRNGKey(0)
    k_h, k_lab, k_drop, k_w, k_crf = jax.random.split(key, 5)

    hidden = jax.random.normal(k_h, (B, S, H), jnp.float32)
    labels = jax.random.randint(k_lab, (B, S), 0, T)
    drop = jax.random.bernoulli(k_drop, 0.3, (B, S))
    drop = drop.at[:, 0].set(False)    # ensure >= 1 valid token per sequence
    labels = jnp.where(drop, -100, labels).astype(jnp.int32)

    w = jax.random.normal(k_w, (H, T), jnp.float32) * 0.02
    b = jnp.zeros((1, T), jnp.float32)
    start, end, trans = make_bio_crf_params(k_crf, T)
    params = dict(w=w, b=b, start=start, end=end, trans=trans)

    (loss,) = bert_crf_forward(hidden, labels, params)
    loss = jax.block_until_ready(loss)
    assert bool(jnp.isfinite(loss)), "CRF loss is not finite"
    print("KERNEL_OK")
</pallas_src>

<mosaic_0001>
module attributes {stable_mosaic.version = 11 : i64} {
  func.func @_head_kernel(%arg0: i32, %arg1: memref<32x32xf32, #tpu.memory_space<vmem>>, %arg2: memref<32x128xf32, #tpu.memory_space<vmem>>, %arg3: memref<1x128xf32, #tpu.memory_space<vmem>>, %arg4: memref<32x128xf32, #tpu.memory_space<vmem>>) attributes {dimension_semantics = [#tpu.dimension_semantics<parallel>], iteration_bounds = array<i64: 1>, scalar_prefetch = 0 : i64, scratch_operands = 0 : i64, tpu.core_type = #tpu.core_type<tc>, window_params = [{transform_indices = @transform_0, window_bounds = array<i64: 32, 32>}, {pipeline_mode = #tpu.pipeline_mode<synchronous>, transform_indices = @transform_1, window_bounds = array<i64: 32, 128>}, {pipeline_mode = #tpu.pipeline_mode<synchronous>, transform_indices = @transform_2, window_bounds = array<i64: 1, 128>}, {transform_indices = @transform_3, window_bounds = array<i64: 32, 128>}]} {
    %c0 = arith.constant 0 : index
    %c0_0 = arith.constant 0 : index
    %0 = vector.load %arg1[%c0, %c0_0] : memref<32x32xf32, #tpu.memory_space<vmem>>, vector<32x32xf32>
    %c0_1 = arith.constant 0 : index
    %c0_2 = arith.constant 0 : index
    %1 = vector.load %arg2[%c0_1, %c0_2] : memref<32x128xf32, #tpu.memory_space<vmem>>, vector<32x128xf32>
    %cst = arith.constant dense<0.000000e+00> : vector<32x128xf32>
    %2 = tpu.matmul %0, %1, %cst {dimension_numbers = #tpu.dot_dimension_numbers<[1], [0], [0], [1], [0, 0, 1, 1], [], []>} : vector<32x32xf32>, vector<32x128xf32>, vector<32x128xf32> -> vector<32x128xf32>
    %c0_3 = arith.constant 0 : index
    %c0_4 = arith.constant 0 : index
    %3 = vector.load %arg3[%c0_3, %c0_4] : memref<1x128xf32, #tpu.memory_space<vmem>>, vector<1x128xf32>
    %4 = vector.broadcast %3 : vector<1x128xf32> to vector<32x128xf32>
    %5 = arith.addf %2, %4 : vector<32x128xf32>
    %c0_5 = arith.constant 0 : index
    %c0_6 = arith.constant 0 : index
    %6 = vector.load %arg4[%c0_5, %c0_6] : memref<32x128xf32, #tpu.memory_space<vmem>>, vector<32x128xf32>
    tpu.vector_store %arg4[%c0_5, %c0_6], %5 {strides = array<i32>} : memref<32x128xf32, #tpu.memory_space<vmem>>, vector<32x128xf32>,
    return
  }
  func.func @transform_0(%arg0: i32) -> (i32, i32) {
    %c0_i32 = arith.constant 0 : i32
    %c0_i32_0 = arith.constant 0 : i32
    return %arg0, %c0_i32 : i32, i32
  }
  func.func @transform_1(%arg0: i32) -> (i32, i32) {
    %c0_i32 = arith.constant 0 : i32
    %c0_i32_0 = arith.constant 0 : i32
    %c0_i32_1 = arith.constant 0 : i32
    return %c0_i32, %c0_i32_0 : i32, i32
  }
  func.func @transform_2(%arg0: i32) -> (i32, i32) {
    %c0_i32 = arith.constant 0 : i32
    %c0_i32_0 = arith.constant 0 : i32
    %c0_i32_1 = arith.constant 0 : i32
    return %c0_i32, %c0_i32_0 : i32, i32
  }
  func.func @transform_3(%arg0: i32) -> (i32, i32) {
    %c0_i32 = arith.constant 0 : i32
    %c0_i32_0 = arith.constant 0 : i32
    return %arg0, %c0_i32 : i32, i32
  }
}

</mosaic_0001>

<bundles_post_ra>
// kernel: tpu_custom_call.1
= control target key start
LH: loop header
LB: loop body
LE: loop exit
PB: predicated region body
PF: predicated region fallthrough
CT: control target
= control target key end

     0   :  { %8 = vsyncpa [#allocation3], 0  ;;  %s330_s0 = inlined_call_operand.hbm [shape: f32[32,32], index: 0, kind: input, shape index: {}]   ;;  %s331_s1 = inlined_call_operand.hbm [shape: f32[32,128], index: 1, kind: input, shape index: {}]   ;;  %s332_s2 = inlined_call_operand.vmem [shape: f32[1,128], index: 2, kind: input, shape index: {}]   ;;  %s333_s3 = inlined_call_operand.hbm [shape: f32[32,128], index: 3, kind: output, shape index: {}]  }
   0x1   :  { %9 = vsyncpa [#allocation6], 0 }
   0x2   :  { %10 = vsyncpa [#allocation4], 0  ;;  %s284_s12 = smov [#allocation2]  }
   0x3   :  { %s16_s13 = sshll.u32 %s284_s12, 4  ;;  %s17_s13 = int_to_ptr.vmem [resolvable:$true] %s16_s13 }
   0x4   :  { %s226_s14 = scalar_lea.vmem %s17_s13, 512  ;;  %p231_p1 = scmp.lt.s32.totalorder %s17_s13, %s17_s13 }
   0x5   :  { %p227_p0 = scmp.ne.s32.totalorder %s17_s13, %s226_s14  ;;  %p232_p2 = scmp.lt.s32.totalorder %s226_s14, %s226_s14 }
   0x7   :  { %p233_p3 = por %p232_p2, %p231_p1 }
   0x9   :  { %p234_p4 = pnand %p233_p3, %p227_p0 }
   0xb   :  { %237 = shalt.err (!%p234_p4)
}
   0xc   :  { %s285_s15 = smov 128   ;;  %s286_s16 = smov 8  }
   0xd   :  { %22 = dma.hbm_to_vmem [thread:$0]  %s330_s0, 512, %s17_s13, [#allocation3], %s285_s15, %s285_s15, %s286_s16  }
   0xe   :  { %s287_s19 = smov [#allocation5]  }
   0xf   :  { %s28_s20 = sshll.u32 %s287_s19, 4  ;;  %s29_s20 = int_to_ptr.vmem [resolvable:$true] %s28_s20 }
  0x10   :  { %s246_s21 = scalar_lea.vmem %s29_s20, 512  ;;  %p251_p6 = scmp.lt.s32.totalorder %s29_s20, %s29_s20 }
  0x11   :  { %p247_p5 = scmp.ne.s32.totalorder %s29_s20, %s246_s21  ;;  %p252_p7 = scmp.lt.s32.totalorder %s246_s21, %s246_s21 }
  0x13   :  { %p253_p8 = por %p252_p7, %p251_p6 }
  0x15   :  { %p254_p9 = pnand %p253_p8, %p247_p5 }
  0x17   :  { %257 = shalt.err (!%p254_p9)
}
  0x18   :  { %34 = dma.hbm_to_vmem [thread:$0]  %s331_s1, 512, %s29_s20, [#allocation6], %s285_s15, %s285_s15, %s286_s16  }
  0x19   :  { %278 = dma.done.wait [#allocation3], 512  }
  0x1a   :  { %279 = vsyncadd [#allocation3], 4294966784 }
  0x1b   :  { %280 = dma.done.wait [#allocation6], 512  }
  0x1c   :  { %281 = vsyncadd [#allocation6], 4294966784  ;;  %v50_v0 = vld [vmem:[#allocation5 + $0x18] sm:$0xff]  ;;  %v49_v1 = vld [vmem:[#allocation5 + $0x10] sm:$0xff]  ;;  %vm58_vm0 = vcmask 261120   ;;  %s288_s24 = smov [#allocation7]  }
  0x1d   :  { %191 = vmatprep.subr.mxu0 %v50_v0  ;;  %205 = vmatprep.subr.mxu1 %v50_v0  ;;  %v48_v2 = vld [vmem:[#allocation5 + $0x8] sm:$0xff]  ;;  %v47_v3 = vld [vmem:[#allocation5] sm:$0xff]  ;;  %v45_v5 = vld [vmem:[#allocation2 + $0x10] sm:$0xff]  ;;  %s165_s25 = sshll.u32 %s288_s24, 4  ;;  %s166_s25 = int_to_ptr.vmem [resolvable:$true] %s165_s25 }
  0x1e   :  { %192 = vmatpush3.msra.mxu0 %v50_v0  ;;  %209 = vmatpush3.msra.mxu1 %v50_v0  ;;  %v43_v4 = vld [vmem:[#allocation2] sm:$0xff]  ;;  %v44_v6 = vld [vmem:[#allocation2 + $0x8] sm:$0xff]  ;;  %v46_v7 = vld [vmem:[#allocation2 + $0x18] sm:$0xff]  ;;  %s258_s26 = scalar_lea.vmem %s166_s25, 512  ;;  %p263_p11 = scmp.lt.s32.totalorder %s166_s25, %s166_s25 }
  0x1f   :  { %193 = vmatprep.subr.mxu0 %v49_v1  ;;  %206 = vmatprep.subr.mxu1 %v49_v1  ;;  %v178_v8 = vld [vmem:[%s332_s2] ss:$0 sm:$0xff]  ;;  %p259_p10 = scmp.ne.s32.totalorder %s166_s25, %s258_s26  ;;  %p264_p12 = scmp.lt.s32.totalorder %s258_s26, %s258_s26 }
  0x20   :  { %194 = vmatpush3.msra.mxu0 %v49_v1  ;;  %210 = vmatpush3.msra.mxu1 %v49_v1 }
  0x21   :  { %195 = vmatprep.subr.mxu0 %v48_v2  ;;  %207 = vmatprep.subr.mxu1 %v48_v2  ;;  %p265_p13 = por %p264_p12, %p263_p11 }
  0x22   :  { %196 = vmatpush3.msra.mxu0 %v48_v2  ;;  %211 = vmatpush3.msra.mxu1 %v48_v2 }
  0x23   :  { %197 = vmatprep.subr.mxu0 %v47_v3  ;;  %208 = vmatprep.subr.mxu1 %v47_v3  ;;  %p266_p0 = pnand %p265_p13, %p259_p10 }
  0x24   :  { %198 = vmatpush3.msra.mxu0 %v47_v3  ;;  %212 = vmatpush3.msra.mxu1 %v47_v3 }
  0x25   :  { %199 = vmatprep.mubr.msk.f32.mxu0 %vm58_vm0, %v43_v4  ;;  %202 = vmatprep.mubr.msk.f32.mxu1 %vm58_vm0, %v45_v5 }
  0x26   :  { %200 = vmatmul.mubr.msk.f32.vlgmr.msra.gmra.mxu0 %vm58_vm0, %v44_v6  ;;  %203 = vmatmul.mubr.msk.f32.vlgmr.msra.gmra.mxu1 %vm58_vm0, %v46_v7 }
  0xe6   :  { %v201_v9 = vpop.f32.mrf.mxu0  ;;  %v204_v10 = vpop.f32.mrf.mxu1 }
  0xe7   :  { %v143_v11 = vadd.f32 %v201_v9, %v178_v8  ;;  %v153_v12 = vadd.f32 %v204_v10, %v178_v8 }
  0xe8   :  { %v137_v13 = vpop.f32.mrf.mxu0  ;;  %v147_v14 = vpop.f32.mrf.mxu1 }
  0xe9   :  { %157 = vst [vmem:[#allocation7 + $0x8] sm:$0xff] %v143_v11  ;;  %159 = vst [vmem:[#allocation7 + $0x18] sm:$0xff] %v153_v12  ;;  %v138_v15 = vadd.f32 %v178_v8, %v137_v13  ;;  %v148_v16 = vadd.f32 %v178_v8, %v147_v14 }
  0xeb   :  { %156 = vst [vmem:[#allocation7] sm:$0xff] %v138_v15  ;;  %158 = vst [vmem:[#allocation7 + $0x10] sm:$0xff] %v148_v16 }
  0xec   :  { %269 = shalt.err (!%p266_p0)
}
  0xed   :  { %171 = dma.vmem_to_hbm [thread:$0]  %s166_s25, 512, %s333_s3, [#allocation4], %s285_s15, %s285_s15, %s286_s16  }
  0xee   :  { %282 = dma.done.wait [#allocation4], 512  }
  0xef   :  { %283 = vsyncadd [#allocation4], 4294966784 }
  0xf0   :  { %175 = vsyncpa [#allocation3], 1 }
  0xf1   :  { %176 = vsyncpa [#allocation6], 1 }
  0xf2   :  { %177 = vsyncpa [#allocation4], 1 }

</bundles_post_ra>
